<compile_context>
chip_gen: v5e
topology: v5e:2x2
jax: 0.10.0
libtpu: 0.0.40
codegen_flags: <defaults>
</compile_context>

<pallas_src>
import math

import jax
import jax.numpy as jnp
from jax import lax
from jax.experimental import pallas as pl
from jax.experimental.pallas import tpu as pltpu

LN_EPS = 1e-12                     # ESM1bLayerNorm default eps
INV_SQRT2 = 1.0 / math.sqrt(2.0)


def _round_up(x, m):
    return ((x + m - 1) // m) * m


def _lm_head_kernel(x_ref,        # (TN, D)    features tile (matmul dtype)
                    w_ref,        # (D, D)     folded dense weight, (in, out)
                    b_ref,        # (1, D)     dense bias (f32)
                    gamma_ref,    # (1, D)     layer-norm scale (f32)
                    beta_ref,     # (1, D)     layer-norm shift (f32)
                    wo_ref,       # (D, TV)    vocab projection tile, (in, out)
                    bo_ref,       # (1, TV)    vocab bias tile (f32)
                    o_ref,        # (TN, TV)   output tile
                    h_ref):       # (TN, D)    scratch (matmul dtype): post-LN h
    # Grid = (token tiles [parallel], vocab tiles [arbitrary]).
    # dense + gelu + layer-norm is computed once per token tile (at the first
    # vocab tile) and kept in the VMEM scratch across all vocab tiles.  The
    # vocab axis MUST stay "arbitrary" (sequential) for this to be valid.
    @pl.when(pl.program_id(1) == 0)
    def _():
        h = jnp.dot(x_ref[...], w_ref[...], preferred_element_type=jnp.float32)
        h = h + b_ref[...]
        # exact (erf) gelu, as used in ESM/RoBERTa heads
        h = 0.5 * h * (1.0 + lax.erf(h * INV_SQRT2))
        # layer norm over the hidden (lane) axis, f32 statistics
        mu = jnp.mean(h, axis=-1, keepdims=True)
        var = jnp.mean((h - mu) * (h - mu), axis=-1, keepdims=True)
        h = (h - mu) * lax.rsqrt(var + LN_EPS)
        h = h * gamma_ref[...] + beta_ref[...]
        h_ref[...] = h.astype(h_ref.dtype)   # stored once at the matmul dtype

    # vocab projection for this vocab tile (MXU at weight dtype, f32 accum)
    out = jnp.dot(h_ref[...], wo_ref[...], preferred_element_type=jnp.float32)
    out = out + bo_ref[...]
    o_ref[...] = out.astype(o_ref.dtype)


def prepare_params(params, lora_scaling, *, tile_v=2048, weight_dtype=None):
    """One-time weight prep, hoisted out of the per-call path.

    - fold LoRA into the dense weight (static inference weights)
    - transpose all weights to (in, out) row-major layout
    - pad the vocab axis to a lane-dense multiple of tile_v (>= 128)
    - optionally cast matmul weights (only) to bf16 for full MXU rate
    """
    D = params["dense_w"].shape[0]
    V = params["out_bias"].shape[-1]

    tile_v = max(128, (int(tile_v) // 128) * 128)
    tile_v = min(tile_v, _round_up(V, 128))
    v_pad = _round_up(V, tile_v)

    # x @ W.T + s * (x @ A.T) @ B.T  ==  x @ (W + s * B @ A).T
    w_eff = params["dense_w"] + lora_scaling * (params["lora_b"] @ params["lora_a"])

    w_eff_t = w_eff.T                                # (D, D)
    out_w_t = params["out_w"].T                      # (D, V)
    out_bias = params["out_bias"].reshape(1, V)
    if v_pad != V:
        out_w_t = jnp.pad(out_w_t, ((0, 0), (0, v_pad - V)))
        out_bias = jnp.pad(out_bias, ((0, 0), (0, v_pad - V)))

    if weight_dtype is not None:                     # e.g. jnp.bfloat16
        w_eff_t = w_eff_t.astype(weight_dtype)
        out_w_t = out_w_t.astype(weight_dtype)

    return {
        "w_eff_t": w_eff_t,
        "dense_b": params["dense_b"].reshape(1, D).astype(jnp.float32),
        "ln_gamma": params["ln_gamma"].reshape(1, D).astype(jnp.float32),
        "ln_beta": params["ln_beta"].reshape(1, D).astype(jnp.float32),
        "out_w_t": out_w_t,
        "out_bias": out_bias.astype(jnp.float32),
        "output_dim": V,        # plain python ints (one-time prep)
        "tile_v": tile_v,
    }


def _vmem_estimate_bytes(tile_n, tile_v, D, mm_bytes, out_bytes):
    """Double-buffered working-set estimate for the pallas_call."""
    return (2 * tile_n * D * mm_bytes          # feature tile (double-buffered)
            + D * D * mm_bytes                 # folded dense weight (1-buffered)
            + 3 * D * 4                        # dense bias + LN gamma/beta (f32)
            + 2 * D * tile_v * mm_bytes        # vocab weight tile (double-buf)
            + 2 * tile_v * 4                   # vocab bias tile
            + 2 * tile_n * tile_v * out_bytes  # output tile (double-buffered)
            + tile_n * D * mm_bytes)           # h scratch


def lora_roberta_lm_head(features, prepped, *, tile_n=512, out_dtype=None,
                         vmem_budget_bytes=48 * 1024 * 1024,
                         vmem_limit_bytes=None):
    """features: (..., D) -> logits (..., V).

    Generation guidance (review): tile_n~1024 on v6e, ~512 on v7x, 256-384 on
    v5e; use weight_dtype=jnp.bfloat16 + bf16 features + out_dtype=bf16 for
    production.  The wrapper auto-shrinks tile_n to fit vmem_budget_bytes.
    """
    *lead, D = features.shape
    N = math.prod(lead) if lead else 1
    V = prepped["output_dim"]
    tile_v = prepped["tile_v"]
    v_pad = prepped["out_w_t"].shape[1]

    mm_dtype = prepped["w_eff_t"].dtype
    out_dtype = out_dtype if out_dtype is not None else features.dtype
    mm_bytes = jnp.dtype(mm_dtype).itemsize
    out_bytes = jnp.dtype(out_dtype).itemsize

    # token tile: multiple of 8 (sublane), clamped to the problem size
    tile_n = max(8, (int(tile_n) // 8) * 8)
    tile_n = min(tile_n, _round_up(N, 8))

    # keep the double-buffered working set inside the explicit VMEM budget
    # (leave ~2 MiB of headroom for compiler-internal scratch)
    while (tile_n > 8 and
           _vmem_estimate_bytes(tile_n, tile_v, D, mm_bytes, out_bytes)
           > vmem_budget_bytes - (2 << 20)):
        tile_n = max(8, (tile_n // 2) // 8 * 8)

    # megacore: make sure there are >= 2 token tiles when possible so both
    # TensorCores (v7x) get a share of the "parallel" axis.
    if _round_up(N, tile_n) // tile_n < 2 and N > 8:
        tile_n = _round_up((N + 1) // 2, 8)

    n_pad = _round_up(N, tile_n)

    # cast features to the matmul dtype ONCE here (halves feature DMA for bf16)
    x2d = features.reshape(N, D).astype(mm_dtype)
    if n_pad != N:
        x2d = jnp.pad(x2d, ((0, n_pad - N), (0, 0)))

    grid = (n_pad // tile_n, v_pad // tile_v)
    limit = int(vmem_limit_bytes if vmem_limit_bytes is not None
                else vmem_budget_bytes)

    def _run(single_buffer_constants):
        if single_buffer_constants:
            # constant-index blocks are loaded once: single-buffer them to
            # save VMEM (D*D*mm_bytes of headroom for bigger tiles).
            const_kw = dict(pipeline_mode=pl.Buffered(1))
        else:
            const_kw = {}
        in_specs = [
            pl.BlockSpec((tile_n, D), lambda i, j: (i, 0)),            # features
            pl.BlockSpec((D, D), lambda i, j: (0, 0), **const_kw),     # dense W^T
            pl.BlockSpec((1, D), lambda i, j: (0, 0), **const_kw),     # dense b
            pl.BlockSpec((1, D), lambda i, j: (0, 0), **const_kw),     # ln gamma
            pl.BlockSpec((1, D), lambda i, j: (0, 0), **const_kw),     # ln beta
            pl.BlockSpec((D, tile_v), lambda i, j: (0, j)),            # vocab W^T
            pl.BlockSpec((1, tile_v), lambda i, j: (0, j)),            # vocab b
        ]
        return pl.pallas_call(
            _lm_head_kernel,
            out_shape=jax.ShapeDtypeStruct((n_pad, v_pad), out_dtype),
            grid_spec=pltpu.PrefetchScalarGridSpec(
                num_scalar_prefetch=0,
                grid=grid,
                in_specs=in_specs,
                out_specs=pl.BlockSpec((tile_n, tile_v), lambda i, j: (i, j)),
                # h scratch held at the matmul dtype: half the VMEM of f32 and
                # no per-vocab-tile re-cast.
                scratch_shapes=[pltpu.VMEM((tile_n, D), mm_dtype)]),
            compiler_params=pltpu.CompilerParams(
                # vocab axis must stay "arbitrary": h scratch filled at j == 0.
                dimension_semantics=("parallel", "arbitrary"),
                vmem_limit_bytes=limit),
        )(x2d, prepped["w_eff_t"], prepped["dense_b"],
          prepped["ln_gamma"], prepped["ln_beta"],
          prepped["out_w_t"], prepped["out_bias"])

    try:
        out2d = _run(True)
    except Exception:
        # pipeline_mode=pl.Buffered(1) not supported on this jax version:
        # fall back to default double-buffering for the constant blocks.
        out2d = _run(False)

    out2d = out2d[:N, :V]
    return out2d.reshape(*lead, V)


def init_params(key, embed_dim, output_dim, lora_r):
    ks = jax.random.split(key, 6)
    scale = 1.0 / math.sqrt(embed_dim)
    return {
        "dense_w": jax.random.normal(ks[0], (embed_dim, embed_dim), jnp.float32) * scale,
        "dense_b": jax.random.normal(ks[1], (embed_dim,), jnp.float32) * 0.02,
        # LoRA: A ~ normal, B = 0 at init (loralib); small nonzero B so the
        # LoRA path is exercised numerically.
        "lora_a": jax.random.normal(ks[2], (lora_r, embed_dim), jnp.float32) * scale,
        "lora_b": jax.random.normal(ks[3], (embed_dim, lora_r), jnp.float32) * 0.01,
        "ln_gamma": jnp.ones((embed_dim,), jnp.float32),
        "ln_beta": jnp.zeros((embed_dim,), jnp.float32),
        # tied embedding matrix passed to __init__: (V, D)
        "out_w": jax.random.normal(ks[4], (output_dim, embed_dim), jnp.float32) * scale,
        "out_bias": jnp.zeros((output_dim,), jnp.float32),
    }


def _reference(features, params, lora_scaling):
    """Pure-JAX reference matching the PyTorch forward (LoRA kept explicit)."""
    x = features.astype(jnp.float32)
    h = x @ params["dense_w"].T + params["dense_b"]
    h = h + lora_scaling * ((x @ params["lora_a"].T) @ params["lora_b"].T)
    h = 0.5 * h * (1.0 + lax.erf(h * INV_SQRT2))
    mu = jnp.mean(h, -1, keepdims=True)
    var = jnp.mean((h - mu) ** 2, -1, keepdims=True)
    h = (h - mu) / jnp.sqrt(var + LN_EPS)
    h = h * params["ln_gamma"] + params["ln_beta"]
    return h @ params["out_w"].T + params["out_bias"]


if __name__ == "__main__":
    # small shapes: batch=2, seq=8, embed_dim=32, vocab(output_dim)=48, lora r=4
    B, S, D, V, R = 2, 8, 32, 48, 4
    LORA_ALPHA = 8.0
    LORA_SCALING = LORA_ALPHA / R

    key = jax.random.PRNGKey(0)
    kf, kp = jax.random.split(key)
    features = jax.random.normal(kf, (B, S, D), jnp.float32)
    params = init_params(kp, D, V, R)

    # One-time weight prep (folded LoRA, transposed, vocab padded lane-dense).
    # Production on v5e/v6e/v7x: weight_dtype=jnp.bfloat16, bf16 features, and
    # lora_roberta_lm_head(..., out_dtype=jnp.bfloat16, tile_n=1024 on v6e /
    # 512 on v7x / 256-384 on v5e).  f32 here so the strict tolerance check
    # against the f32 reference holds.
    prepped = prepare_params(params, LORA_SCALING, tile_v=2048, weight_dtype=None)

    out = lora_roberta_lm_head(features, prepped, tile_n=512)
    out = jax.block_until_ready(out)

    ref = _reference(features, params, LORA_SCALING)
    assert out.shape == (B, S, V), out.shape
    err = float(jnp.max(jnp.abs(out - ref)))
    assert jnp.allclose(out, ref, atol=1e-4, rtol=1e-4), err

    print("KERNEL_OK")
</pallas_src>

<mosaic_0001>
module attributes {stable_mosaic.version = 11 : i64} {
  func.func @_lm_head_kernel(%arg0: i32, %arg1: i32, %arg2: memref<8x32xf32, #tpu.memory_space<vmem>>, %arg3: memref<32x32xf32, #tpu.memory_space<vmem>>, %arg4: memref<1x32xf32, #tpu.memory_space<vmem>>, %arg5: memref<1x32xf32, #tpu.memory_space<vmem>>, %arg6: memref<1x32xf32, #tpu.memory_space<vmem>>, %arg7: memref<32x128xf32, #tpu.memory_space<vmem>>, %arg8: memref<1x128xf32, #tpu.memory_space<vmem>>, %arg9: memref<8x128xf32, #tpu.memory_space<vmem>>, %arg10: memref<8x32xf32, #tpu.memory_space<vmem>>) attributes {dimension_semantics = [#tpu.dimension_semantics<parallel>, #tpu.dimension_semantics<arbitrary>], iteration_bounds = array<i64: 2, 1>, scalar_prefetch = 0 : i64, scratch_operands = 1 : i64, tpu.core_type = #tpu.core_type<tc>, window_params = [{transform_indices = @transform_0, window_bounds = array<i64: 8, 32>}, {pipeline_mode = #tpu.pipeline_mode<synchronous>, transform_indices = @transform_1, window_bounds = array<i64: 32, 32>}, {pipeline_mode = #tpu.pipeline_mode<synchronous>, transform_indices = @transform_2, window_bounds = array<i64: 1, 32>}, {pipeline_mode = #tpu.pipeline_mode<synchronous>, transform_indices = @transform_3, window_bounds = array<i64: 1, 32>}, {pipeline_mode = #tpu.pipeline_mode<synchronous>, transform_indices = @transform_4, window_bounds = array<i64: 1, 32>}, {transform_indices = @transform_5, window_bounds = array<i64: 32, 128>}, {transform_indices = @transform_6, window_bounds = array<i64: 1, 128>}, {transform_indices = @transform_7, window_bounds = array<i64: 8, 128>}]} {
    %c0_i32 = arith.constant 0 : i32
    %0 = arith.cmpi eq, %arg1, %c0_i32 : i32
    %1 = arith.extui %0 : i1 to i32
    %c0_i32_0 = arith.constant 0 : i32
    %2 = arith.cmpi ne, %1, %c0_i32_0 : i32
    scf.if %2 {
      %c0_8 = arith.constant 0 : index
      %c0_9 = arith.constant 0 : index
      %10 = vector.load %arg2[%c0_8, %c0_9] : memref<8x32xf32, #tpu.memory_space<vmem>>, vector<8x32xf32>
      %c0_10 = arith.constant 0 : index
      %c0_11 = arith.constant 0 : index
      %11 = vector.load %arg3[%c0_10, %c0_11] : memref<32x32xf32, #tpu.memory_space<vmem>>, vector<32x32xf32>
      %cst_12 = arith.constant dense<0.000000e+00> : vector<8x32xf32>
      %12 = tpu.matmul %10, %11, %cst_12 {dimension_numbers = #tpu.dot_dimension_numbers<[1], [0], [0], [1], [0, 0, 1, 1], [], []>} : vector<8x32xf32>, vector<32x32xf32>, vector<8x32xf32> -> vector<8x32xf32>
      %c0_13 = arith.constant 0 : index
      %c0_14 = arith.constant 0 : index
      %13 = vector.load %arg4[%c0_13, %c0_14] : memref<1x32xf32, #tpu.memory_space<vmem>>, vector<1x32xf32>
      %14 = vector.broadcast %13 : vector<1x32xf32> to vector<8x32xf32>
      %15 = arith.addf %12, %14 : vector<8x32xf32>
      %cst_15 = arith.constant 5.000000e-01 : f32
      %16 = vector.broadcast %cst_15 : f32 to vector<8x32xf32>
      %17 = arith.mulf %16, %15 : vector<8x32xf32>
      %cst_16 = arith.constant 0.707106769 : f32
      %18 = vector.broadcast %cst_16 : f32 to vector<8x32xf32>
      %19 = arith.mulf %15, %18 : vector<8x32xf32>
      %20 = math.erf %19 : vector<8x32xf32>
      %cst_17 = arith.constant 1.000000e+00 : f32
      %21 = vector.broadcast %cst_17 : f32 to vector<8x32xf32>
      %22 = arith.addf %21, %20 : vector<8x32xf32>
      %23 = arith.mulf %17, %22 : vector<8x32xf32>
      %cst_18 = arith.constant dense<0.000000e+00> : vector<8xf32>
      %24 = vector.multi_reduction <add>, %23, %cst_18 [1] : vector<8x32xf32> to vector<8xf32>
      %25 = vector.shape_cast %24 : vector<8xf32> to vector<8x1xf32>
      %cst_19 = arith.constant 3.200000e+01 : f32
      %26 = vector.broadcast %cst_19 : f32 to vector<8x1xf32>
      %27 = arith.divf %25, %26 : vector<8x1xf32>
      %28 = vector.broadcast %27 : vector<8x1xf32> to vector<8x32xf32>
      %29 = arith.subf %23, %28 : vector<8x32xf32>
      %30 = vector.broadcast %27 : vector<8x1xf32> to vector<8x32xf32>
      %31 = arith.subf %23, %30 : vector<8x32xf32>
      %32 = arith.mulf %29, %31 : vector<8x32xf32>
      %cst_20 = arith.constant dense<0.000000e+00> : vector<8xf32>
      %33 = vector.multi_reduction <add>, %32, %cst_20 [1] : vector<8x32xf32> to vector<8xf32>
      %34 = vector.shape_cast %33 : vector<8xf32> to vector<8x1xf32>
      %cst_21 = arith.constant 3.200000e+01 : f32
      %35 = vector.broadcast %cst_21 : f32 to vector<8x1xf32>
      %36 = arith.divf %34, %35 : vector<8x1xf32>
      %37 = vector.broadcast %27 : vector<8x1xf32> to vector<8x32xf32>
      %38 = arith.subf %23, %37 : vector<8x32xf32>
      %cst_22 = arith.constant 9.99999996E-13 : f32
      %39 = vector.broadcast %cst_22 : f32 to vector<8x1xf32>
      %40 = arith.addf %36, %39 : vector<8x1xf32>
      %41 = math.rsqrt %40 : vector<8x1xf32>
      %42 = vector.broadcast %41 : vector<8x1xf32> to vector<8x32xf32>
      %43 = arith.mulf %38, %42 : vector<8x32xf32>
      %c0_23 = arith.constant 0 : index
      %c0_24 = arith.constant 0 : index
      %44 = vector.load %arg5[%c0_23, %c0_24] : memref<1x32xf32, #tpu.memory_space<vmem>>, vector<1x32xf32>
      %45 = vector.broadcast %44 : vector<1x32xf32> to vector<8x32xf32>
      %46 = arith.mulf %43, %45 : vector<8x32xf32>
      %c0_25 = arith.constant 0 : index
      %c0_26 = arith.constant 0 : index
      %47 = vector.load %arg6[%c0_25, %c0_26] : memref<1x32xf32, #tpu.memory_space<vmem>>, vector<1x32xf32>
      %48 = vector.broadcast %47 : vector<1x32xf32> to vector<8x32xf32>
      %49 = arith.addf %46, %48 : vector<8x32xf32>
      %c0_27 = arith.constant 0 : index
      %c0_28 = arith.constant 0 : index
      %50 = vector.load %arg10[%c0_27, %c0_28] : memref<8x32xf32, #tpu.memory_space<vmem>>, vector<8x32xf32>
      tpu.vector_store %arg10[%c0_27, %c0_28], %49 {strides = array<i32>} : memref<8x32xf32, #tpu.memory_space<vmem>>, vector<8x32xf32>,
    } else {
    }
    %c0 = arith.constant 0 : index
    %c0_1 = arith.constant 0 : index
    %3 = vector.load %arg10[%c0, %c0_1] : memref<8x32xf32, #tpu.memory_space<vmem>>, vector<8x32xf32>
    %c0_2 = arith.constant 0 : index
    %c0_3 = arith.constant 0 : index
    %4 = vector.load %arg7[%c0_2, %c0_3] : memref<32x128xf32, #tpu.memory_space<vmem>>, vector<32x128xf32>
    %cst = arith.constant dense<0.000000e+00> : vector<8x128xf32>
    %5 = tpu.matmul %3, %4, %cst {dimension_numbers = #tpu.dot_dimension_numbers<[1], [0], [0], [1], [0, 0, 1, 1], [], []>} : vector<8x32xf32>, vector<32x128xf32>, vector<8x128xf32> -> vector<8x128xf32>
    %c0_4 = arith.constant 0 : index
    %c0_5 = arith.constant 0 : index
    %6 = vector.load %arg8[%c0_4, %c0_5] : memref<1x128xf32, #tpu.memory_space<vmem>>, vector<1x128xf32>
    %7 = vector.broadcast %6 : vector<1x128xf32> to vector<8x128xf32>
    %8 = arith.addf %5, %7 : vector<8x128xf32>
    %c0_6 = arith.constant 0 : index
    %c0_7 = arith.constant 0 : index
    %9 = vector.load %arg9[%c0_6, %c0_7] : memref<8x128xf32, #tpu.memory_space<vmem>>, vector<8x128xf32>
    tpu.vector_store %arg9[%c0_6, %c0_7], %8 {strides = array<i32>} : memref<8x128xf32, #tpu.memory_space<vmem>>, vector<8x128xf32>,
    return
  }
  func.func @transform_0(%arg0: i32, %arg1: i32) -> (i32, i32) {
    %c0_i32 = arith.constant 0 : i32
    %c0_i32_0 = arith.constant 0 : i32
    return %arg0, %c0_i32 : i32, i32
  }
  func.func @transform_1(%arg0: i32, %arg1: i32) -> (i32, i32) {
    %c0_i32 = arith.constant 0 : i32
    %c0_i32_0 = arith.constant 0 : i32
    %c0_i32_1 = arith.constant 0 : i32
    return %c0_i32, %c0_i32_0 : i32, i32
  }
  func.func @transform_2(%arg0: i32, %arg1: i32) -> (i32, i32) {
    %c0_i32 = arith.constant 0 : i32
    %c0_i32_0 = arith.constant 0 : i32
    %c0_i32_1 = arith.constant 0 : i32
    return %c0_i32, %c0_i32_0 : i32, i32
  }
  func.func @transform_3(%arg0: i32, %arg1: i32) -> (i32, i32) {
    %c0_i32 = arith.constant 0 : i32
    %c0_i32_0 = arith.constant 0 : i32
    %c0_i32_1 = arith.constant 0 : i32
    return %c0_i32, %c0_i32_0 : i32, i32
  }
  func.func @transform_4(%arg0: i32, %arg1: i32) -> (i32, i32) {
    %c0_i32 = arith.constant 0 : i32
    %c0_i32_0 = arith.constant 0 : i32
    %c0_i32_1 = arith.constant 0 : i32
    return %c0_i32, %c0_i32_0 : i32, i32
  }
  func.func @transform_5(%arg0: i32, %arg1: i32) -> (i32, i32) {
    %c0_i32 = arith.constant 0 : i32
    %c0_i32_0 = arith.constant 0 : i32
    return %c0_i32, %arg1 : i32, i32
  }
  func.func @transform_6(%arg0: i32, %arg1: i32) -> (i32, i32) {
    %c0_i32 = arith.constant 0 : i32
    %c0_i32_0 = arith.constant 0 : i32
    return %c0_i32, %arg1 : i32, i32
  }
  func.func @transform_7(%arg0: i32, %arg1: i32) -> (i32, i32) {
    %c0_i32 = arith.constant 0 : i32
    return %arg0, %arg1 : i32, i32
  }
}

module attributes {stable_mosaic.version = 11 : i64} {
  func.func @_lm_head_kernel(%arg0: i32, %arg1: i32, %arg2: memref<8x32xf32, #tpu.memory_space<vmem>>, %arg3: memref<32x32xf32, #tpu.memory_space<vmem>>, %arg4: memref<1x32xf32, #tpu.memory_space<vmem>>, %arg5: memref<1x32xf32, #tpu.memory_space<vmem>>, %arg6: memref<1x32xf32, #tpu.memory_space<vmem>>, %arg7: memref<32x128xf32, #tpu.memory_space<vmem>>, %arg8: memref<1x128xf32, #tpu.memory_space<vmem>>, %arg9: memref<8x128xf32, #tpu.memory_space<vmem>>, %arg10: memref<8x32xf32, #tpu.memory_space<vmem>>) attributes {dimension_semantics = [#tpu.dimension_semantics<parallel>, #tpu.dimension_semantics<arbitrary>], iteration_bounds = array<i64: 2, 1>, scalar_prefetch = 0 : i64, scratch_operands = 1 : i64, tpu.core_type = #tpu.core_type<tc>, window_params = [{transform_indices = @transform_0, window_bounds = array<i64: 8, 32>}, {pipeline_mode = #tpu.pipeline_mode<synchronous>, transform_indices = @transform_1, window_bounds = array<i64: 32, 32>}, {pipeline_mode = #tpu.pipeline_mode<synchronous>, transform_indices = @transform_2, window_bounds = array<i64: 1, 32>}, {pipeline_mode = #tpu.pipeline_mode<synchronous>, transform_indices = @transform_3, window_bounds = array<i64: 1, 32>}, {pipeline_mode = #tpu.pipeline_mode<synchronous>, transform_indices = @transform_4, window_bounds = array<i64: 1, 32>}, {transform_indices = @transform_5, window_bounds = array<i64: 32, 128>}, {transform_indices = @transform_6, window_bounds = array<i64: 1, 128>}, {transform_indices = @transform_7, window_bounds = array<i64: 8, 128>}]} {
    %c0_i32 = arith.constant 0 : i32
    %0 = arith.cmpi eq, %arg1, %c0_i32 : i32
    %1 = arith.extui %0 : i1 to i32
    %c0_i32_0 = arith.constant 0 : i32
    %2 = arith.cmpi ne, %1, %c0_i32_0 : i32
    scf.if %2 {
      %c0_8 = arith.constant 0 : index
      %c0_9 = arith.constant 0 : index
      %10 = vector.load %arg2[%c0_8, %c0_9] : memref<8x32xf32, #tpu.memory_space<vmem>>, vector<8x32xf32>
      %c0_10 = arith.constant 0 : index
      %c0_11 = arith.constant 0 : index
      %11 = vector.load %arg3[%c0_10, %c0_11] : memref<32x32xf32, #tpu.memory_space<vmem>>, vector<32x32xf32>
      %cst_12 = arith.constant dense<0.000000e+00> : vector<8x32xf32>
      %12 = tpu.matmul %10, %11, %cst_12 {dimension_numbers = #tpu.dot_dimension_numbers<[1], [0], [0], [1], [0, 0, 1, 1], [], []>} : vector<8x32xf32>, vector<32x32xf32>, vector<8x32xf32> -> vector<8x32xf32>
      %c0_13 = arith.constant 0 : index
      %c0_14 = arith.constant 0 : index
      %13 = vector.load %arg4[%c0_13, %c0_14] : memref<1x32xf32, #tpu.memory_space<vmem>>, vector<1x32xf32>
      %14 = vector.broadcast %13 : vector<1x32xf32> to vector<8x32xf32>
      %15 = arith.addf %12, %14 : vector<8x32xf32>
      %cst_15 = arith.constant 5.000000e-01 : f32
      %16 = vector.broadcast %cst_15 : f32 to vector<8x32xf32>
      %17 = arith.mulf %16, %15 : vector<8x32xf32>
      %cst_16 = arith.constant 0.707106769 : f32
      %18 = vector.broadcast %cst_16 : f32 to vector<8x32xf32>
      %19 = arith.mulf %15, %18 : vector<8x32xf32>
      %20 = math.erf %19 : vector<8x32xf32>
      %cst_17 = arith.constant 1.000000e+00 : f32
      %21 = vector.broadcast %cst_17 : f32 to vector<8x32xf32>
      %22 = arith.addf %21, %20 : vector<8x32xf32>
      %23 = arith.mulf %17, %22 : vector<8x32xf32>
      %cst_18 = arith.constant dense<0.000000e+00> : vector<8xf32>
      %24 = vector.multi_reduction <add>, %23, %cst_18 [1] : vector<8x32xf32> to vector<8xf32>
      %25 = vector.shape_cast %24 : vector<8xf32> to vector<8x1xf32>
      %cst_19 = arith.constant 3.200000e+01 : f32
      %26 = vector.broadcast %cst_19 : f32 to vector<8x1xf32>
      %27 = arith.divf %25, %26 : vector<8x1xf32>
      %28 = vector.broadcast %27 : vector<8x1xf32> to vector<8x32xf32>
      %29 = arith.subf %23, %28 : vector<8x32xf32>
      %30 = vector.broadcast %27 : vector<8x1xf32> to vector<8x32xf32>
      %31 = arith.subf %23, %30 : vector<8x32xf32>
      %32 = arith.mulf %29, %31 : vector<8x32xf32>
      %cst_20 = arith.constant dense<0.000000e+00> : vector<8xf32>
      %33 = vector.multi_reduction <add>, %32, %cst_20 [1] : vector<8x32xf32> to vector<8xf32>
      %34 = vector.shape_cast %33 : vector<8xf32> to vector<8x1xf32>
      %cst_21 = arith.constant 3.200000e+01 : f32
      %35 = vector.broadcast %cst_21 : f32 to vector<8x1xf32>
      %36 = arith.divf %34, %35 : vector<8x1xf32>
      %37 = vector.broadcast %27 : vector<8x1xf32> to vector<8x32xf32>
      %38 = arith.subf %23, %37 : vector<8x32xf32>
      %cst_22 = arith.constant 9.99999996E-13 : f32
      %39 = vector.broadcast %cst_22 : f32 to vector<8x1xf32>
      %40 = arith.addf %36, %39 : vector<8x1xf32>
      %41 = math.rsqrt %40 : vector<8x1xf32>
      %42 = vector.broadcast %41 : vector<8x1xf32> to vector<8x32xf32>
      %43 = arith.mulf %38, %42 : vector<8x32xf32>
      %c0_23 = arith.constant 0 : index
      %c0_24 = arith.constant 0 : index
      %44 = vector.load %arg5[%c0_23, %c0_24] : memref<1x32xf32, #tpu.memory_space<vmem>>, vector<1x32xf32>
      %45 = vector.broadcast %44 : vector<1x32xf32> to vector<8x32xf32>
      %46 = arith.mulf %43, %45 : vector<8x32xf32>
      %c0_25 = arith.constant 0 : index
      %c0_26 = arith.constant 0 : index
      %47 = vector.load %arg6[%c0_25, %c0_26] : memref<1x32xf32, #tpu.memory_space<vmem>>, vector<1x32xf32>
      %48 = vector.broadcast %47 : vector<1x32xf32> to vector<8x32xf32>
      %49 = arith.addf %46, %48 : vector<8x32xf32>
      %c0_27 = arith.constant 0 : index
      %c0_28 = arith.constant 0 : index
      %50 = vector.load %arg10[%c0_27, %c0_28] : memref<8x32xf32, #tpu.memory_space<vmem>>, vector<8x32xf32>
      tpu.vector_store %arg10[%c0_27, %c0_28], %49 {strides = array<i32>} : memref<8x32xf32, #tpu.memory_space<vmem>>, vector<8x32xf32>,
    } else {
    }
    %c0 = arith.constant 0 : index
    %c0_1 = arith.constant 0 : index
    %3 = vector.load %arg10[%c0, %c0_1] : memref<8x32xf32, #tpu.memory_space<vmem>>, vector<8x32xf32>
    %c0_2 = arith.constant 0 : index
    %c0_3 = arith.constant 0 : index
    %4 = vector.load %arg7[%c0_2, %c0_3] : memref<32x128xf32, #tpu.memory_space<vmem>>, vector<32x128xf32>
    %cst = arith.constant dense<0.000000e+00> : vector<8x128xf32>
    %5 = tpu.matmul %3, %4, %cst {dimension_numbers = #tpu.dot_dimension_numbers<[1], [0], [0], [1], [0, 0, 1, 1], [], []>} : vector<8x32xf32>, vector<32x128xf32>, vector<8x128xf32> -> vector<8x128xf32>
    %c0_4 = arith.constant 0 : index
    %c0_5 = arith.constant 0 : index
    %6 = vector.load %arg8[%c0_4, %c0_5] : memref<1x128xf32, #tpu.memory_space<vmem>>, vector<1x128xf32>
    %7 = vector.broadcast %6 : vector<1x128xf32> to vector<8x128xf32>
    %8 = arith.addf %5, %7 : vector<8x128xf32>
    %c0_6 = arith.constant 0 : index
    %c0_7 = arith.constant 0 : index
    %9 = vector.load %arg9[%c0_6, %c0_7] : memref<8x128xf32, #tpu.memory_space<vmem>>, vector<8x128xf32>
    tpu.vector_store %arg9[%c0_6, %c0_7], %8 {strides = array<i32>} : memref<8x128xf32, #tpu.memory_space<vmem>>, vector<8x128xf32>,
    return
  }
  func.func @transform_0(%arg0: i32, %arg1: i32) -> (i32, i32) {
    %c0_i32 = arith.constant 0 : i32
    %c0_i32_0 = arith.constant 0 : i32
    return %arg0, %c0_i32 : i32, i32
  }
  func.func @transform_1(%arg0: i32, %arg1: i32) -> (i32, i32) {
    %c0_i32 = arith.constant 0 : i32
    %c0_i32_0 = arith.constant 0 : i32
    %c0_i32_1 = arith.constant 0 : i32
    return %c0_i32, %c0_i32_0 : i32, i32
  }
  func.func @transform_2(%arg0: i32, %arg1: i32) -> (i32, i32) {
    %c0_i32 = arith.constant 0 : i32
    %c0_i32_0 = arith.constant 0 : i32
    %c0_i32_1 = arith.constant 0 : i32
    return %c0_i32, %c0_i32_0 : i32, i32
  }
  func.func @transform_3(%arg0: i32, %arg1: i32) -> (i32, i32) {
    %c0_i32 = arith.constant 0 : i32
    %c0_i32_0 = arith.constant 0 : i32
    %c0_i32_1 = arith.constant 0 : i32
    return %c0_i32, %c0_i32_0 : i32, i32
  }
  func.func @transform_4(%arg0: i32, %arg1: i32) -> (i32, i32) {
    %c0_i32 = arith.constant 0 : i32
    %c0_i32_0 = arith.constant 0 : i32
    %c0_i32_1 = arith.constant 0 : i32
    return %c0_i32, %c0_i32_0 : i32, i32
  }
  func.func @transform_5(%arg0: i32, %arg1: i32) -> (i32, i32) {
    %c0_i32 = arith.constant 0 : i32
    %c0_i32_0 = arith.constant 0 : i32
    return %c0_i32, %arg1 : i32, i32
  }
  func.func @transform_6(%arg0: i32, %arg1: i32) -> (i32, i32) {
    %c0_i32 = arith.constant 0 : i32
    %c0_i32_0 = arith.constant 0 : i32
    return %c0_i32, %arg1 : i32, i32
  }
  func.func @transform_7(%arg0: i32, %arg1: i32) -> (i32, i32) {
    %c0_i32 = arith.constant 0 : i32
    return %arg0, %arg1 : i32, i32
  }
}

</mosaic_0001>

<bundles_post_ra>
// kernel: tpu_custom_call.1
= control target key start
LH: loop header
LB: loop body
LE: loop exit
PB: predicated region body
PF: predicated region fallthrough
CT: control target
= control target key end

     0   :  { %s1153_s0 = inlined_call_operand.hbm [shape: f32[16,32], index: 0, kind: input, shape index: {}]   ;;  %s1154_s1 = inlined_call_operand.hbm [shape: f32[32,32], index: 1, kind: input, shape index: {}]   ;;  %s1155_s2 = inlined_call_operand.vmem [shape: f32[1,32], index: 2, kind: input, shape index: {}]   ;;  %s1156_s3 = inlined_call_operand.vmem [shape: f32[1,32], index: 3, kind: input, shape index: {}]   ;;  %s1157_s4 = inlined_call_operand.vmem [shape: f32[1,32], index: 4, kind: input, shape index: {}]   ;;  %s1158_s5 = inlined_call_operand.hbm [shape: f32[32,128], index: 5, kind: input, shape index: {}]   ;;  %s1159_s6 = inlined_call_operand.vmem [shape: f32[1,128], index: 6, kind: input, shape index: {}]   ;;  %s1160_s7 = inlined_call_operand.hbm [shape: f32[16,128], index: 7, kind: output, shape index: {}]  }
   0x1   :  { %1161 = sst [smem:[#allocation13_spill]] %s1154_s1 }
   0x2   :  { %12 = vsyncpa [#allocation4], 0 }
   0x3   :  { %14 = vsyncpa [#allocation4 + $0x1], 0 }
   0x4   :  { %15 = vsyncpa [#allocation7], 0 }
   0x5   :  { %16 = vsyncpa [#allocation5], 0 }
   0x6   :  { %18 = vsyncpa [#allocation5 + $0x1], 0  ;;  %s988_s24 = smov 0   ;;  %s990_s25 = smov 0  }
   0x7   :  { %s992_s26 = smov 0   ;;  %s994_s27 = smov 0  }
   0x8   :  { %s996_s28 = smov 0   ;;  %s998_s29 = smov 0  }
   0x9 LB: > { %s648_s30 = sadd.s32 4294967295, %s941_s29   ;;  %p650_p0 = scmp.ge.s32.totalorder %s941_s29, 1  ;;  %s941_s29 = sphi %s998_s29, %s24_s29   ;;  %s937_s28 = sphi %s996_s28, %s1172_s28   ;;  %s933_s27 = sphi %s994_s27, %s1171_s27   ;;  %s929_s26 = sphi %s992_s26, %s1170_s26   ;;  %s925_s25 = sphi %s990_s25, %s1169_s25   ;;  %s921_s24 = sphi %s988_s24, %s1168_s24  }
   0xa   : > { %p1022_p1 = scmp.eq.s32.totalorder %s648_s30, 0  ;;  %p231_p2 = scmp.lt.s32.totalorder %s941_s29, 3 }
   0xb   : > { %s1163_s1 = sld [smem:[#allocation13_spill]]  ;;  %s943_s13 = smov [#allocation6]  }
   0xc   : > { %p1030_p3 = pnand %p650_p0, %p231_p2  ;;  %s244_s14 = sshll.u32 %s943_s13, 4  ;;  %s245_s14 = int_to_ptr.vmem [resolvable:$true] %s244_s14 }
   0xd   : > { %p654_p6 = scmp.ge.s32.totalorder %s941_s29, 2  ;;  %s267_s17 = sshll.u32 %s1158_s5, 4  ;;  %s268_s17 = int_to_ptr.hbm [resolvable:$true] %s267_s17 }
   0xe   : > { %p681_p4 = pneg %p1030_p3  ;;  %s944_s18 = smov 128  }
   0xf   : > { %s945_s19 = smov 8   ;;  %s946_s20 = smov [#allocation8]  }
  0x10   : > { %p682_p5 = pnand %p681_p4, %p1022_p1  ;;  %s269_s21 = sshll.u32 %s946_s20, 4  ;;  %s270_s21 = int_to_ptr.vmem [resolvable:$true] %s269_s21 }
  0x11   : > { %s242_s11 = sshll.u32 %s1163_s1, 4  ;;  %s36_s22 = sadd.s32 1, %s937_s28  ;;  %s243_s11 = int_to_ptr.hbm [resolvable:$true] %s242_s11 }
  0x12   : > { %684 = dma.hbm_to_vmem [thread:$0]  (!%p682_p5), %s243_s11, 512, %s245_s14, [#allocation7], %s944_s18, %s944_s18, %s945_s19  }
  0x13   : > { %687 = dma.hbm_to_vmem [thread:$0]  (!%p682_p5), %s268_s17, 512, %s270_s21, [#allocation7], %s944_s18, %s944_s18, %s945_s19  }
  0x14   : > { %s649_s23 = sadd.s32 4294967294, %s941_s29   ;;  %p38_p7 = scmp.ge.s32.totalorder %s36_s22, 2 }
  0x15   : > { %s43_s9 = sadd.s32 1, %s929_s26  ;;  %p50_p8 = scmp.ne.s32.totalorder %s929_s26, %s925_s25 }
  0x16   : > { %s1174_s22 = smov (%p38_p7, %s36_s22), 0  ;;  %p51_p9 = scmp.eq.s32.totalorder %s941_s29, 0 }
  0x17   : > { %p56_p10 = scmp.ne.s32.totalorder %s925_s25, %s921_s24  ;;  %s40_s10 = ssub.s32 %s937_s28, %s1174_s22 }
  0x18   : > { %p218_p11 = scmp.eq.s32.totalorder %s648_s30, 1  ;;  %p41_p12 = scmp.eq.s32.totalorder %s40_s10, 0 }
  0x19   : > { %p1058_p13 = por %p1022_p1, %p56_p10  ;;  %p224_p2 = scmp.eq.s32.totalorder %s649_s23, 1 }
  0x1a   : > { %p1062_p0 = por %p218_p11, %p50_p8  ;;  %p52_p4 = por %p51_p9, %p50_p8 }
  0x1b   : > { %s1067_s14 = scalar_select %p41_p12, %s929_s26, %s43_s9  }
  0x1c   : > { %p1069_p5 = por %p224_p2, %p56_p10  ;;  %s289_s16 = sand.u32 1, %s929_s26  }
  0x1d   : > { %s656_s30 = sshll.u32 %s937_s28, 3  ;;  %p698_p7 = scmp.lt.s32.totalorder %s941_s29, 2 }
  0x1e   : > { %s655_s17 = sshll.u32 %s289_s16, 3  ;;  %s297_s20 = scalar_lea.hbm %s1153_s0, %s656_s30 }
  0x1f   : > { %s299_s21 = sshll.u32 %s297_s20, 4  ;;  %s293_s10 = scalar_lea.vmem [#allocation3], %s655_s17  ;;  %s300_s21 = int_to_ptr.hbm [resolvable:$true] %s299_s21 }
  0x20   : > { %s301_s1 = sshll.u32 %s293_s10, 4  ;;  %p689_p11 = pnand %p698_p7, %p52_p4  ;;  %s302_s1 = int_to_ptr.vmem [resolvable:$true] %s301_s1 }
  0x21   : > { %s290_s23 = scalar_lea.sflag [#allocation4], %s289_s16  ;;  %310 = sbr.rel (%p1030_p3) target bundleno = 635 (0x27b), region = 48 }
  0x22   : > { %691 = dma.hbm_to_vmem [thread:$0]  (!%p689_p11), %s300_s21, 128, %s302_s1, %s290_s23  }
  0x23   : > { %s1082_s9 = sand.u32 (!%p1030_p3), 1, %s925_s25  }
  0x24   : > { %s658_s18 = sshll.u32 (!%p1030_p3), %s1082_s9, 3  ;;  %s313_s30 = scalar_lea.sflag (!%p1030_p3), [#allocation4], %s1082_s9 }
  0x25   : > { %s316_s17 = scalar_lea.vmem (!%p1030_p3), [#allocation3], %s658_s18 }
  0x26   : > { %908 = dma.done.wait (%p1058_p13), %s313_s30, 128  }
  0x27   : > { %910 = vsyncadd (%p1058_p13), %s313_s30, 4294967168 }
  0x28   : > { %912 = dma.done.wait (%p1022_p1), [#allocation7], 1024  }
  0x29   : > { %914 = vsyncadd (%p1022_p1), [#allocation7], 4294966272  ;;  %v372_v0 = vld [vmem:[#allocation6 + $0x18] sm:$0xff]  ;;  %v371_v1 = vld [vmem:[#allocation6 + $0x10] sm:$0xff]  ;;  %vm377_vm0 = vcmask 261120   ;;  %v947_v48 = vmov 32.0  }
  0x2a   : > { %393 = vmatpush.msra.mxu0 %v372_v0  ;;  %v370_v2 = vld [vmem:[#allocation6 + $0x8] sm:$0xff]  ;;  %v369_v3 = vld [vmem:[#allocation6] sm:$0xff]  ;;  %v368_v4 = vld [vmem:[%s316_s17] sm:$0xff]  ;;  %s666_s20 = sshll.u32 %s933_s27, 3  ;;  %s360_s1 = scalar_lea.vmem [#allocation9], %s658_s18 }
  0x2b   : > { %v755_v5 = vld [vmem:[%s1155_s2] ss:$0 sm:$0xff]  ;;  %v489_v60 = vld [vmem:[#allocation8 + $0x18] sm:$0xff]  ;;  %v488_v61 = vld [vmem:[#allocation8 + $0x10] sm:$0xff]  ;;  %s531_s23 = scalar_lea.hbm %s1160_s7, %s666_s20  ;;  %s533_s12 = sshll.u32 %s360_s1, 4  ;;  %s534_s12 = int_to_ptr.vmem [resolvable:$true] %s533_s12 }
  0x2c   : > { %394 = vmatpush.msra.mxu0 %v371_v1  ;;  %510 = vmatpush.msra.mxu1 %v489_v60  ;;  %v487_v62 = vld [vmem:[#allocation8 + $0x8] sm:$0xff]  ;;  %v486_v1 = vld [vmem:[#allocation8] sm:$0xff]  ;;  %s535_s8 = sshll.u32 %s531_s23, 4  ;;  %s520_s11 = scalar_lea.sflag [#allocation5], %s1082_s9  ;;  %s536_s8 = int_to_ptr.hbm [resolvable:$true] %s535_s8 }
  0x2d   : > { %s869_s27 = sshra.s32 %s536_s8, 4  ;;  %s875_s21 = scalar_lea.hbm %s1160_s7, 16  ;;  %s870_s27 = int_to_ptr.hbm [resolvable:$true] %s869_s27 }
  0x2e   : > { %395 = vmatpush.msra.mxu0 %v370_v2  ;;  %511 = vmatpush.msra.mxu1 %v488_v61  ;;  %s871_s16 = scalar_lea.hbm %s870_s27, 8  ;;  %p876_p9 = scmp.lt.s32.totalorder %s870_s27, %s1160_s7 }
  0x2f   : > { %p872_p1 = scmp.ne.s32.totalorder %s870_s27, %s871_s16  ;;  %p877_p10 = scmp.lt.s32.totalorder %s875_s21, %s871_s16 }
  0x30   : > { %396 = vmatpush.msra.mxu0 %v369_v3  ;;  %512 = vmatpush.msra.mxu1 %v487_v62 }
  0x31   : > { %662 = vmatmul.msk.f32.vlgmr.msra.gmra.mxu0 %vm377_vm0, %v368_v4  ;;  %p873_p3 = pnand %p872_p1, %p1062_p0  ;;  %p878_p12 = por %p877_p10, %p876_p9 }
  0x32   : > { %513 = vmatpush.msra.mxu1 %v486_v1 }
  0x33   : > { %p874_p8 = pneg %p873_p3 }
  0x35   : > { %p879_p13 = pnand %p878_p12, %p874_p8 }
  0xae   : > { %v398_v6 = vpop.f32.mrf.mxu0 }
  0xaf   : > { %v399_v7 = vadd.f32 %v755_v5, %v398_v6 }
  0xb1   : > { %v402_v8 = vmul.f32 0.70710677, %v399_v7  ;;  %v401_v44 = vmul.f32 0.5, %v399_v7 }
  0xb3   : > { %v403_v9 = vmul.f32 %v402_v8, %v402_v8 }
  0xb5   : > { %v404_v10 = vmin.f32 %v403_v9, 16.0  ;;  %v756_v9 = vld [vmem:[%s1156_s3] ss:$0 sm:$0xff] }
  0xb7   : > { %v405_v11 = vmul.f32 2.1237322e-06, %v404_v10  ;;  %v416_v12 = vmul.f32 3.8918573e-05, %v404_v10 }
  0xb9   : > { %v406_v13 = vadd.f32 0.00028619796, %v405_v11  ;;  %v417_v14 = vadd.f32 0.001143296, %v416_v12  ;;  %v757_v11 = vld [vmem:[%s1157_s4] ss:$0 sm:$0xff] }
  0xbb   : > { %v407_v15 = vmul.f32 %v406_v13, %v404_v10  ;;  %v418_v16 = vmul.f32 %v417_v14, %v404_v10 }
  0xbd   : > { %v419_v17 = vadd.f32 0.014752088, %v418_v16  ;;  %v408_v18 = vadd.f32 0.0036580483, %v407_v15  ;;  %v758_v16 = vld [vmem:[%s1159_s6] ss:$0 sm:$0xff] }
  0xbf   : > { %v420_v19 = vmul.f32 %v419_v17, %v404_v10  ;;  %v409_v21 = vmul.f32 %v408_v18, %v404_v10 }
  0xc1   : > { %v421_v20 = vadd.f32 0.112945676, %v420_v19  ;;  %v410_v24 = vadd.f32 0.05243302, %v409_v21 }
  0xc3   : > { %v422_v22 = vmul.f32 %v421_v20, %v404_v10  ;;  %v411_v27 = vmul.f32 %v410_v24, %v404_v10 }
  0xc5   : > { %v423_v23 = vadd.f32 0.4994258, %v422_v22  ;;  %v412_v28 = vadd.f32 0.18741608, %v411_v27 }
  0xc7   : > { %v424_v25 = vmul.f32 %v423_v23, %v404_v10  ;;  %v413_v30 = vmul.f32 %v412_v28, %v404_v10 }
  0xc9   : > { %v425_v26 = vadd.f32 1.0, %v424_v25  ;;  %v414_v34 = vadd.f32 1.1283791, %v413_v30 }
  0xcb   : > { %759 = vrcp.f32 %v425_v26  ;;  %v437_v33 = vand.u32 2147483648, %v425_v26  ;;  %v435_v36 = vand.u32 2147483647, %v425_v26  ;;  %vm431_vm2 = vweird.f32 %v425_v26 }
  0xcc   : > { %v415_v39 = vmul.f32 %v414_v34, %v402_v8  ;;  %761 = vrcp.f32 %v947_v48 }
  0xcd   : > { %v438_v38 = vor.u32 1.1754944e-38, %v437_v33  ;;  %vm436_vm4 = vcmp.eq.f32.partialorder %v435_v36, 8.507059e+37 }
  0xd1   : > { %v760_v29 = vpop.eup %759 }
  0xd2   : > { %v427_v31 = vmul.f32 %v760_v29, %v425_v26  ;;  %vm432_vm1 = vweird.f32 %v760_v29  ;;  %v762_v49 = vpop.eup %761 }
  0xd3   : > { %vm433_vm3 = vmor %vm431_vm2, %vm432_vm1  ;;  %v449_v50 = vmul.f32 32.0, %v762_v49  ;;  %vm453_vm5 = vweird.f32 %v762_v49 }
  0xd4   : > { %v428_v32 = vsub.f32 1.0, %v427_v31 }
  0xd5   : > { %v450_v51 = vsub.f32 1.0, %v449_v50 }
  0xd6   : > { %v429_v35 = vmul.f32 %v760_v29, %v428_v32 }
  0xd7   : > { %v451_v52 = vmul.f32 %v762_v49, %v450_v51 }
  0xd8   : > { %v430_v37 = vadd.f32 %v760_v29, %v429_v35 }
  0xd9   : > { %v452_v53 = vadd.f32 %v762_v49, %v451_v52 }
  0xda   : > { %v434_v40 = vsel %vm433_vm3, %v760_v29, %v430_v37 }
  0xdb   : > { %v439_v41 = vsel %vm436_vm4, %v438_v38, %v434_v40  ;;  %v454_v54 = vsel %vm453_vm5, %v762_v49, %v452_v53 }
  0xdc   : > { %v440_v42 = vmul.f32 %v439_v41, %v415_v39 }
  0xde   : > { %v663_v43 = vclamps-f32 %v440_v42, 1.0 }
  0xe0   : > { %v443_v45 = vadd.f32 1.0, %v663_v43 }
  0xe2   : > { %v444_v46 = vmul.f32 %v443_v45, %v401_v44 }
  0xe4   : > { %v445_v47 = vsel %vm377_vm0, %v444_v46, 0.0 }
  0xe5   : > { %446 = vadd.xlane.f32.xlu0 %v445_v47 }
 0x158   : > { %v447_v55 = vpop.xlane.xlu0 %446 }
 0x159   : > { %v455_v56 = vmul.f32 %v454_v54, %v447_v55 }
 0x15b   : > { %v456_v57 = vsub.f32 %v444_v46, %v455_v56 }
 0x15d   : > { %v457_v58 = vmul.f32 %v456_v57, %v456_v57 }
 0x15f   : > { %v458_v59 = vsel %vm377_vm0, %v457_v58, 0.0 }
 0x160   : > { %459 = vadd.xlane.f32.xlu0 %v458_v59 }
 0x1d3   : > { %v460_v63 = vpop.xlane.xlu0 %459 }
 0x1d4   : > { %v461_v0 = vmul.f32 %v460_v63, %v454_v54 }
 0x1d6   : > { %v462_v2 = vadd.f32 1e-12, %v461_v0 }
 0x1d8   : > { %763 = vrsqrt.f32 %v462_v2  ;;  %vm469_vm7 = vweird.f32 %v462_v2 }
 0x1de   : > { %v764_v3 = vpop.eup %763 }
 0x1df   : > { %v464_v4 = vmul.f32 %v764_v3, %v462_v2  ;;  %vm470_vm6 = vweird.f32 %v764_v3 }
 0x1e0   : > { %vm471_vm8 = vmor %vm469_vm7, %vm470_vm6 }
 0x1e1   : > { %v465_v5 = vmul.f32 %v764_v3, %v464_v4 }
 0x1e3   : > { %v466_v6 = vmul.f32 0.5, %v465_v5 }
 0x1e5   : > { %v467_v7 = vsub.f32 1.5, %v466_v6 }
 0x1e7   : > { %v468_v8 = vmul.f32 %v764_v3, %v467_v7 }
 0x1e9   : > { %v472_v10 = vsel %vm471_vm8, %v764_v3, %v468_v8 }
 0x1ea   : > { %v473_v12 = vmul.f32 %v472_v10, %v456_v57 }
 0x1ec   : > { %v478_v13 = vmul.f32 %v756_v9, %v473_v12 }
 0x1ee   : > { %v483_v14 = vadd.f32 %v757_v11, %v478_v13 }
 0x1f0   : > { %484 = vst.msk [vmem:[#allocation2] sm:$0xff] %vm377_vm0, %v483_v14 }
 0x1f7   : > { %v485_v15 = vld [vmem:[#allocation2] sm:$0xff] }
 0x1f8   : > { %664 = vmatmul.msk.f32.vlgmr.msra.gmra.mxu1 %vm377_vm0, %v485_v15 }
 0x275   : > { %v515_v17 = vpop.f32.mrf.mxu1 }
 0x276   : > { %v516_v18 = vadd.f32 %v758_v16, %v515_v17 }
 0x278   : > { %518 = vst [vmem:[%s360_s1] sm:$0xff] %v516_v18 }
 0x279   : > { %882 = shalt.err (!%p879_p13)
}
 0x27a   : > { %679 = dma.vmem_to_hbm [thread:$0]  (%p1062_p0), %s534_s12, 128, %s536_s8, %s520_s11  }
 0x27b PF: > { %s547_s9 = sand.u32 1, %s921_s24   ;;  %p693_p2 = pnand %p654_p6, %p1069_p5 }
 0x27c   : > { %s548_s23 = scalar_lea.sflag [#allocation5], %s547_s9 }
 0x27d   : > { %p694_p4 = pneg %p693_p2 }
 0x27f   : > { %916 = dma.done.wait (%p694_p4), %s548_s23, 128  }
 0x280   : > { %918 = vsyncadd (%p694_p4), %s548_s23, 4294967168  ;;  %s24_s29 = sadd.s32 1, %s941_s29   ;;  %s1168_s24 = smov %s925_s25 }
 0x281   : > { %p21_p7 = scmp.ge.s32.totalorder %s24_s29, 4   ;;  %s1169_s25 = smov %s929_s26 }
 0x282   : > { %s1170_s26 = smov %s1067_s14  ;;  %s1171_s27 = smov %s937_s28 }
 0x283   : > { %s1172_s28 = smov %s1174_s22  ;;  %23 = sbr.rel (!%p21_p7) target bundleno = 9 (0x9), region = 109 }
 0x288   :  { %554 = vsyncpa [#allocation4], 1 }
 0x289   :  { %556 = vsyncpa [#allocation4 + $0x1], 1 }
 0x28a   :  { %557 = vsyncpa [#allocation7], 1 }
 0x28b   :  { %558 = vsyncpa [#allocation5], 1 }
 0x28c   :  { %560 = vsyncpa [#allocation5 + $0x1], 1 }

// kernel: tpu_custom_call.1
= control target key start
LH: loop header
LB: loop body
LE: loop exit
PB: predicated region body
PF: predicated region fallthrough
CT: control target
= control target key end

     0   :  { %s1153_s0 = inlined_call_operand.hbm [shape: f32[16,32], index: 0, kind: input, shape index: {}]   ;;  %s1154_s1 = inlined_call_operand.hbm [shape: f32[32,32], index: 1, kind: input, shape index: {}]   ;;  %s1155_s2 = inlined_call_operand.vmem [shape: f32[1,32], index: 2, kind: input, shape index: {}]   ;;  %s1156_s3 = inlined_call_operand.vmem [shape: f32[1,32], index: 3, kind: input, shape index: {}]   ;;  %s1157_s4 = inlined_call_operand.vmem [shape: f32[1,32], index: 4, kind: input, shape index: {}]   ;;  %s1158_s5 = inlined_call_operand.hbm [shape: f32[32,128], index: 5, kind: input, shape index: {}]   ;;  %s1159_s6 = inlined_call_operand.vmem [shape: f32[1,128], index: 6, kind: input, shape index: {}]   ;;  %s1160_s7 = inlined_call_operand.hbm [shape: f32[16,128], index: 7, kind: output, shape index: {}]  }
   0x1   :  { %1161 = sst [smem:[#allocation13_spill]] %s1154_s1 }
   0x2   :  { %12 = vsyncpa [#allocation4], 0 }
   0x3   :  { %14 = vsyncpa [#allocation4 + $0x1], 0 }
   0x4   :  { %15 = vsyncpa [#allocation7], 0 }
   0x5   :  { %16 = vsyncpa [#allocation5], 0 }
   0x6   :  { %18 = vsyncpa [#allocation5 + $0x1], 0  ;;  %s988_s24 = smov 0   ;;  %s990_s25 = smov 0  }
   0x7   :  { %s992_s26 = smov 0   ;;  %s994_s27 = smov 0  }
   0x8   :  { %s996_s28 = smov 0   ;;  %s998_s29 = smov 0  }
   0x9 LB: > { %s648_s30 = sadd.s32 4294967295, %s941_s29   ;;  %p650_p0 = scmp.ge.s32.totalorder %s941_s29, 1  ;;  %s941_s29 = sphi %s998_s29, %s24_s29   ;;  %s937_s28 = sphi %s996_s28, %s1172_s28   ;;  %s933_s27 = sphi %s994_s27, %s1171_s27   ;;  %s929_s26 = sphi %s992_s26, %s1170_s26   ;;  %s925_s25 = sphi %s990_s25, %s1169_s25   ;;  %s921_s24 = sphi %s988_s24, %s1168_s24  }
   0xa   : > { %p1022_p1 = scmp.eq.s32.totalorder %s648_s30, 0  ;;  %p231_p2 = scmp.lt.s32.totalorder %s941_s29, 3 }
   0xb   : > { %s1163_s1 = sld [smem:[#allocation13_spill]]  ;;  %s943_s13 = smov [#allocation6]  }
   0xc   : > { %p1030_p3 = pnand %p650_p0, %p231_p2  ;;  %s244_s14 = sshll.u32 %s943_s13, 4  ;;  %s245_s14 = int_to_ptr.vmem [resolvable:$true] %s244_s14 }
   0xd   : > { %p654_p6 = scmp.ge.s32.totalorder %s941_s29, 2  ;;  %s267_s17 = sshll.u32 %s1158_s5, 4  ;;  %s268_s17 = int_to_ptr.hbm [resolvable:$true] %s267_s17 }
   0xe   : > { %p681_p4 = pneg %p1030_p3  ;;  %s944_s18 = smov 128  }
   0xf   : > { %s945_s19 = smov 8   ;;  %s946_s20 = smov [#allocation8]  }
  0x10   : > { %p682_p5 = pnand %p681_p4, %p1022_p1  ;;  %s269_s21 = sshll.u32 %s946_s20, 4  ;;  %s270_s21 = int_to_ptr.vmem [resolvable:$true] %s269_s21 }
  0x11   : > { %s242_s11 = sshll.u32 %s1163_s1, 4  ;;  %s36_s22 = sadd.s32 1, %s937_s28  ;;  %s243_s11 = int_to_ptr.hbm [resolvable:$true] %s242_s11 }
  0x12   : > { %684 = dma.hbm_to_vmem [thread:$0]  (!%p682_p5), %s243_s11, 512, %s245_s14, [#allocation7], %s944_s18, %s944_s18, %s945_s19  }
  0x13   : > { %687 = dma.hbm_to_vmem [thread:$0]  (!%p682_p5), %s268_s17, 512, %s270_s21, [#allocation7], %s944_s18, %s944_s18, %s945_s19  }
  0x14   : > { %s649_s23 = sadd.s32 4294967294, %s941_s29   ;;  %p38_p7 = scmp.ge.s32.totalorder %s36_s22, 2 }
  0x15   : > { %s43_s9 = sadd.s32 1, %s929_s26  ;;  %p50_p8 = scmp.ne.s32.totalorder %s929_s26, %s925_s25 }
  0x16   : > { %s1174_s22 = smov (%p38_p7, %s36_s22), 0  ;;  %p51_p9 = scmp.eq.s32.totalorder %s941_s29, 0 }
  0x17   : > { %p56_p10 = scmp.ne.s32.totalorder %s925_s25, %s921_s24  ;;  %s40_s10 = ssub.s32 %s937_s28, %s1174_s22 }
  0x18   : > { %p218_p11 = scmp.eq.s32.totalorder %s648_s30, 1  ;;  %p41_p12 = scmp.eq.s32.totalorder %s40_s10, 0 }
  0x19   : > { %p1058_p13 = por %p1022_p1, %p56_p10  ;;  %p224_p2 = scmp.eq.s32.totalorder %s649_s23, 1 }
  0x1a   : > { %p1062_p0 = por %p218_p11, %p50_p8  ;;  %p52_p4 = por %p51_p9, %p50_p8 }
  0x1b   : > { %s1067_s14 = scalar_select %p41_p12, %s929_s26, %s43_s9  }
  0x1c   : > { %p1069_p5 = por %p224_p2, %p56_p10  ;;  %s289_s16 = sand.u32 1, %s929_s26  }
  0x1d   : > { %s656_s30 = sshll.u32 %s937_s28, 3  ;;  %p698_p7 = scmp.lt.s32.totalorder %s941_s29, 2 }
  0x1e   : > { %s655_s17 = sshll.u32 %s289_s16, 3  ;;  %s297_s20 = scalar_lea.hbm %s1153_s0, %s656_s30 }
  0x1f   : > { %s299_s21 = sshll.u32 %s297_s20, 4  ;;  %s293_s10 = scalar_lea.vmem [#allocation3], %s655_s17  ;;  %s300_s21 = int_to_ptr.hbm [resolvable:$true] %s299_s21 }
  0x20   : > { %s301_s1 = sshll.u32 %s293_s10, 4  ;;  %p689_p11 = pnand %p698_p7, %p52_p4  ;;  %s302_s1 = int_to_ptr.vmem [resolvable:$true] %s301_s1 }
  0x21   : > { %s290_s23 = scalar_lea.sflag [#allocation4], %s289_s16  ;;  %310 = sbr.rel (%p1030_p3) target bundleno = 635 (0x27b), region = 48 }
  0x22   : > { %691 = dma.hbm_to_vmem [thread:$0]  (!%p689_p11), %s300_s21, 128, %s302_s1, %s290_s23  }
  0x23   : > { %s1082_s9 = sand.u32 (!%p1030_p3), 1, %s925_s25  }
  0x24   : > { %s658_s18 = sshll.u32 (!%p1030_p3), %s1082_s9, 3  ;;  %s313_s30 = scalar_lea.sflag (!%p1030_p3), [#allocation4], %s1082_s9 }
  0x25   : > { %s316_s17 = scalar_lea.vmem (!%p1030_p3), [#allocation3], %s658_s18 }
  0x26   : > { %908 = dma.done.wait (%p1058_p13), %s313_s30, 128  }
  0x27   : > { %910 = vsyncadd (%p1058_p13), %s313_s30, 4294967168 }
  0x28   : > { %912 = dma.done.wait (%p1022_p1), [#allocation7], 1024  }
  0x29   : > { %914 = vsyncadd (%p1022_p1), [#allocation7], 4294966272  ;;  %v372_v0 = vld [vmem:[#allocation6 + $0x18] sm:$0xff]  ;;  %v371_v1 = vld [vmem:[#allocation6 + $0x10] sm:$0xff]  ;;  %vm377_vm0 = vcmask 261120   ;;  %v947_v48 = vmov 32.0  }
  0x2a   : > { %393 = vmatpush.msra.mxu0 %v372_v0  ;;  %v370_v2 = vld [vmem:[#allocation6 + $0x8] sm:$0xff]  ;;  %v369_v3 = vld [vmem:[#allocation6] sm:$0xff]  ;;  %v368_v4 = vld [vmem:[%s316_s17] sm:$0xff]  ;;  %s666_s20 = sshll.u32 %s933_s27, 3  ;;  %s360_s1 = scalar_lea.vmem [#allocation9], %s658_s18 }
  0x2b   : > { %v755_v5 = vld [vmem:[%s1155_s2] ss:$0 sm:$0xff]  ;;  %v489_v60 = vld [vmem:[#allocation8 + $0x18] sm:$0xff]  ;;  %v488_v61 = vld [vmem:[#allocation8 + $0x10] sm:$0xff]  ;;  %s531_s23 = scalar_lea.hbm %s1160_s7, %s666_s20  ;;  %s533_s12 = sshll.u32 %s360_s1, 4  ;;  %s534_s12 = int_to_ptr.vmem [resolvable:$true] %s533_s12 }
  0x2c   : > { %394 = vmatpush.msra.mxu0 %v371_v1  ;;  %510 = vmatpush.msra.mxu1 %v489_v60  ;;  %v487_v62 = vld [vmem:[#allocation8 + $0x8] sm:$0xff]  ;;  %v486_v1 = vld [vmem:[#allocation8] sm:$0xff]  ;;  %s535_s8 = sshll.u32 %s531_s23, 4  ;;  %s520_s11 = scalar_lea.sflag [#allocation5], %s1082_s9  ;;  %s536_s8 = int_to_ptr.hbm [resolvable:$true] %s535_s8 }
  0x2d   : > { %s869_s27 = sshra.s32 %s536_s8, 4  ;;  %s875_s21 = scalar_lea.hbm %s1160_s7, 16  ;;  %s870_s27 = int_to_ptr.hbm [resolvable:$true] %s869_s27 }
  0x2e   : > { %395 = vmatpush.msra.mxu0 %v370_v2  ;;  %511 = vmatpush.msra.mxu1 %v488_v61  ;;  %s871_s16 = scalar_lea.hbm %s870_s27, 8  ;;  %p876_p9 = scmp.lt.s32.totalorder %s870_s27, %s1160_s7 }
  0x2f   : > { %p872_p1 = scmp.ne.s32.totalorder %s870_s27, %s871_s16  ;;  %p877_p10 = scmp.lt.s32.totalorder %s875_s21, %s871_s16 }
  0x30   : > { %396 = vmatpush.msra.mxu0 %v369_v3  ;;  %512 = vmatpush.msra.mxu1 %v487_v62 }
  0x31   : > { %662 = vmatmul.msk.f32.vlgmr.msra.gmra.mxu0 %vm377_vm0, %v368_v4  ;;  %p873_p3 = pnand %p872_p1, %p1062_p0  ;;  %p878_p12 = por %p877_p10, %p876_p9 }
  0x32   : > { %513 = vmatpush.msra.mxu1 %v486_v1 }
  0x33   : > { %p874_p8 = pneg %p873_p3 }
  0x35   : > { %p879_p13 = pnand %p878_p12, %p874_p8 }
  0xae   : > { %v398_v6 = vpop.f32.mrf.mxu0 }
  0xaf   : > { %v399_v7 = vadd.f32 %v755_v5, %v398_v6 }
  0xb1   : > { %v402_v8 = vmul.f32 0.70710677, %v399_v7  ;;  %v401_v44 = vmul.f32 0.5, %v399_v7 }
  0xb3   : > { %v403_v9 = vmul.f32 %v402_v8, %v402_v8 }
  0xb5   : > { %v404_v10 = vmin.f32 %v403_v9, 16.0  ;;  %v756_v9 = vld [vmem:[%s1156_s3] ss:$0 sm:$0xff] }
  0xb7   : > { %v405_v11 = vmul.f32 2.1237322e-06, %v404_v10  ;;  %v416_v12 = vmul.f32 3.8918573e-05, %v404_v10 }
  0xb9   : > { %v406_v13 = vadd.f32 0.00028619796, %v405_v11  ;;  %v417_v14 = vadd.f32 0.001143296, %v416_v12  ;;  %v757_v11 = vld [vmem:[%s1157_s4] ss:$0 sm:$0xff] }
  0xbb   : > { %v407_v15 = vmul.f32 %v406_v13, %v404_v10  ;;  %v418_v16 = vmul.f32 %v417_v14, %v404_v10 }
  0xbd   : > { %v419_v17 = vadd.f32 0.014752088, %v418_v16  ;;  %v408_v18 = vadd.f32 0.0036580483, %v407_v15  ;;  %v758_v16 = vld [vmem:[%s1159_s6] ss:$0 sm:$0xff] }
  0xbf   : > { %v420_v19 = vmul.f32 %v419_v17, %v404_v10  ;;  %v409_v21 = vmul.f32 %v408_v18, %v404_v10 }
  0xc1   : > { %v421_v20 = vadd.f32 0.112945676, %v420_v19  ;;  %v410_v24 = vadd.f32 0.05243302, %v409_v21 }
  0xc3   : > { %v422_v22 = vmul.f32 %v421_v20, %v404_v10  ;;  %v411_v27 = vmul.f32 %v410_v24, %v404_v10 }
  0xc5   : > { %v423_v23 = vadd.f32 0.4994258, %v422_v22  ;;  %v412_v28 = vadd.f32 0.18741608, %v411_v27 }
  0xc7   : > { %v424_v25 = vmul.f32 %v423_v23, %v404_v10  ;;  %v413_v30 = vmul.f32 %v412_v28, %v404_v10 }
  0xc9   : > { %v425_v26 = vadd.f32 1.0, %v424_v25  ;;  %v414_v34 = vadd.f32 1.1283791, %v413_v30 }
  0xcb   : > { %759 = vrcp.f32 %v425_v26  ;;  %v437_v33 = vand.u32 2147483648, %v425_v26  ;;  %v435_v36 = vand.u32 2147483647, %v425_v26  ;;  %vm431_vm2 = vweird.f32 %v425_v26 }
  0xcc   : > { %v415_v39 = vmul.f32 %v414_v34, %v402_v8  ;;  %761 = vrcp.f32 %v947_v48 }
  0xcd   : > { %v438_v38 = vor.u32 1.1754944e-38, %v437_v33  ;;  %vm436_vm4 = vcmp.eq.f32.partialorder %v435_v36, 8.507059e+37 }
  0xd1   : > { %v760_v29 = vpop.eup %759 }
  0xd2   : > { %v427_v31 = vmul.f32 %v760_v29, %v425_v26  ;;  %vm432_vm1 = vweird.f32 %v760_v29  ;;  %v762_v49 = vpop.eup %761 }
  0xd3   : > { %vm433_vm3 = vmor %vm431_vm2, %vm432_vm1  ;;  %v449_v50 = vmul.f32 32.0, %v762_v49  ;;  %vm453_vm5 = vweird.f32 %v762_v49 }
  0xd4   : > { %v428_v32 = vsub.f32 1.0, %v427_v31 }
  0xd5   : > { %v450_v51 = vsub.f32 1.0, %v449_v50 }
  0xd6   : > { %v429_v35 = vmul.f32 %v760_v29, %v428_v32 }
  0xd7   : > { %v451_v52 = vmul.f32 %v762_v49, %v450_v51 }
  0xd8   : > { %v430_v37 = vadd.f32 %v760_v29, %v429_v35 }
  0xd9   : > { %v452_v53 = vadd.f32 %v762_v49, %v451_v52 }
  0xda   : > { %v434_v40 = vsel %vm433_vm3, %v760_v29, %v430_v37 }
  0xdb   : > { %v439_v41 = vsel %vm436_vm4, %v438_v38, %v434_v40  ;;  %v454_v54 = vsel %vm453_vm5, %v762_v49, %v452_v53 }
  0xdc   : > { %v440_v42 = vmul.f32 %v439_v41, %v415_v39 }
  0xde   : > { %v663_v43 = vclamps-f32 %v440_v42, 1.0 }
  0xe0   : > { %v443_v45 = vadd.f32 1.0, %v663_v43 }
  0xe2   : > { %v444_v46 = vmul.f32 %v443_v45, %v401_v44 }
  0xe4   : > { %v445_v47 = vsel %vm377_vm0, %v444_v46, 0.0 }
  0xe5   : > { %446 = vadd.xlane.f32.xlu0 %v445_v47 }
 0x158   : > { %v447_v55 = vpop.xlane.xlu0 %446 }
 0x159   : > { %v455_v56 = vmul.f32 %v454_v54, %v447_v55 }
 0x15b   : > { %v456_v57 = vsub.f32 %v444_v46, %v455_v56 }
 0x15d   : > { %v457_v58 = vmul.f32 %v456_v57, %v456_v57 }
 0x15f   : > { %v458_v59 = vsel %vm377_vm0, %v457_v58, 0.0 }
 0x160   : > { %459 = vadd.xlane.f32.xlu0 %v458_v59 }
 0x1d3   : > { %v460_v63 = vpop.xlane.xlu0 %459 }
 0x1d4   : > { %v461_v0 = vmul.f32 %v460_v63, %v454_v54 }
 0x1d6   : > { %v462_v2 = vadd.f32 1e-12, %v461_v0 }
 0x1d8   : > { %763 = vrsqrt.f32 %v462_v2  ;;  %vm469_vm7 = vweird.f32 %v462_v2 }
 0x1de   : > { %v764_v3 = vpop.eup %763 }
 0x1df   : > { %v464_v4 = vmul.f32 %v764_v3, %v462_v2  ;;  %vm470_vm6 = vweird.f32 %v764_v3 }
 0x1e0   : > { %vm471_vm8 = vmor %vm469_vm7, %vm470_vm6 }
 0x1e1   : > { %v465_v5 = vmul.f32 %v764_v3, %v464_v4 }
 0x1e3   : > { %v466_v6 = vmul.f32 0.5, %v465_v5 }
 0x1e5   : > { %v467_v7 = vsub.f32 1.5, %v466_v6 }
 0x1e7   : > { %v468_v8 = vmul.f32 %v764_v3, %v467_v7 }
 0x1e9   : > { %v472_v10 = vsel %vm471_vm8, %v764_v3, %v468_v8 }
 0x1ea   : > { %v473_v12 = vmul.f32 %v472_v10, %v456_v57 }
 0x1ec   : > { %v478_v13 = vmul.f32 %v756_v9, %v473_v12 }
 0x1ee   : > { %v483_v14 = vadd.f32 %v757_v11, %v478_v13 }
 0x1f0   : > { %484 = vst.msk [vmem:[#allocation2] sm:$0xff] %vm377_vm0, %v483_v14 }
 0x1f7   : > { %v485_v15 = vld [vmem:[#allocation2] sm:$0xff] }
 0x1f8   : > { %664 = vmatmul.msk.f32.vlgmr.msra.gmra.mxu1 %vm377_vm0, %v485_v15 }
 0x275   : > { %v515_v17 = vpop.f32.mrf.mxu1 }
 0x276   : > { %v516_v18 = vadd.f32 %v758_v16, %v515_v17 }
 0x278   : > { %518 = vst [vmem:[%s360_s1] sm:$0xff] %v516_v18 }
 0x279   : > { %882 = shalt.err (!%p879_p13)
}
 0x27a   : > { %679 = dma.vmem_to_hbm [thread:$0]  (%p1062_p0), %s534_s12, 128, %s536_s8, %s520_s11  }
 0x27b PF: > { %s547_s9 = sand.u32 1, %s921_s24   ;;  %p693_p2 = pnand %p654_p6, %p1069_p5 }
 0x27c   : > { %s548_s23 = scalar_lea.sflag [#allocation5], %s547_s9 }
 0x27d   : > { %p694_p4 = pneg %p693_p2 }
 0x27f   : > { %916 = dma.done.wait (%p694_p4), %s548_s23, 128  }
 0x280   : > { %918 = vsyncadd (%p694_p4), %s548_s23, 4294967168  ;;  %s24_s29 = sadd.s32 1, %s941_s29   ;;  %s1168_s24 = smov %s925_s25 }
 0x281   : > { %p21_p7 = scmp.ge.s32.totalorder %s24_s29, 4   ;;  %s1169_s25 = smov %s929_s26 }
 0x282   : > { %s1170_s26 = smov %s1067_s14  ;;  %s1171_s27 = smov %s937_s28 }
 0x283   : > { %s1172_s28 = smov %s1174_s22  ;;  %23 = sbr.rel (!%p21_p7) target bundleno = 9 (0x9), region = 109 }
 0x288   :  { %554 = vsyncpa [#allocation4], 1 }
 0x289   :  { %556 = vsyncpa [#allocation4 + $0x1], 1 }
 0x28a   :  { %557 = vsyncpa [#allocation7], 1 }
 0x28b   :  { %558 = vsyncpa [#allocation5], 1 }
 0x28c   :  { %560 = vsyncpa [#allocation5 + $0x1], 1 }

</bundles_post_ra>
